<compile_context>
chip_gen: v7x
topology: tpu7x:2x2x1
jax: 0.10.0
libtpu: 0.0.40
codegen_flags: <defaults>
</compile_context>

<pallas_src>
import functools

import jax
import jax.numpy as jnp
from jax.experimental import pallas as pl
from jax.experimental.pallas import tpu as pltpu


def _round_up(v, m):
    return ((v + m - 1) // m) * m


def _simam_kernel(x_ref, o_ref, *, hw, n, e_lambda):
    # x_ref: (tm, hw_pad) tile -- tm independent channels; columns >= hw are zero.
    x = x_ref[...].astype(jnp.float32)

    # One-pass moments.  Zero-padded columns contribute 0 to both sums, so using
    # the true spatial size `hw` below keeps mu and s exact.
    sum_x = jnp.sum(x, axis=-1, keepdims=True)
    sum_x2 = jnp.sum(x * x, axis=-1, keepdims=True)
    mu = sum_x * (1.0 / hw)
    s = sum_x2 - sum_x * mu                      # = sum_{valid}(x - mu)^2

    denom = 4.0 * (s * (1.0 / n) + e_lambda)     # (tm, 1): per-row scalar
    k = pl.reciprocal(denom, approx=False)       # exact; negligible cost per row

    d = x - mu
    y = d * d * k + 0.5
    # sigmoid(y) == 0.5 * tanh(0.5 * y) + 0.5  (single EUP transcendental/elem)
    o_ref[...] = (0.5 * jnp.tanh(0.5 * y) + 0.5).astype(o_ref.dtype)


def simam(x, e_lambda=0.0001, *, target_tile_bytes=2 * 1024 * 1024):
    """x: (B, C, H, W). Returns sigmoid attention weights, same shape/dtype."""
    b, c, h, w = x.shape
    hw = h * w
    n = float(hw - 1)          # H*W == 1 -> same 0/0 behavior as the PyTorch ref
    bc = b * c

    itemsize = jnp.dtype(x.dtype).itemsize
    pack = max(8, 32 // itemsize)                # sublane pack: 8 f32, 16 bf16, 32 i8

    # Lane-dense last dim: pad H*W to a multiple of 128 with zeros.
    hw_pad = _round_up(hw, 128)
    x2d = x.reshape(bc, hw)
    if hw_pad != hw:
        x2d = jnp.pad(x2d, ((0, 0), (0, hw_pad - hw)))

    # VMEM-budgeted row tile (large tiles amortize the ~0.35 us/step overhead).
    row_bytes = hw_pad * itemsize
    tm = max(pack, (target_tile_bytes // row_bytes) // pack * pack)
    tm = min(tm, _round_up(bc, pack))

    # Prefer >= 2 grid steps so the "parallel" axis can split across v7x's 2 TCs.
    if -(-bc // tm) == 1 and bc > pack:
        tm = min(tm, max(pack, _round_up(-(-bc // 2), pack)))

    num_steps = -(-bc // tm)

    # VMEM budget: double-buffered in + out tiles plus f32 compute temporaries.
    tile_io_bytes = tm * hw_pad * itemsize
    tile_f32_bytes = tm * hw_pad * 4
    vmem_est = 4 * tile_io_bytes + 4 * tile_f32_bytes + (8 << 20)
    vmem_limit = int(min(max(vmem_est, 32 << 20), 48 << 20))   # <= 48 MiB: v7x-safe

    kernel = functools.partial(
        _simam_kernel, hw=float(hw), n=n, e_lambda=float(e_lambda)
    )

    out2d = pl.pallas_call(
        kernel,
        out_shape=jax.ShapeDtypeStruct((bc, hw_pad), x.dtype),
        grid_spec=pltpu.PrefetchScalarGridSpec(
            num_scalar_prefetch=0,
            grid=(num_steps,),
            in_specs=[pl.BlockSpec((tm, hw_pad), lambda i: (i, 0))],
            out_specs=pl.BlockSpec((tm, hw_pad), lambda i: (i, 0)),
        ),
        compiler_params=pltpu.CompilerParams(
            dimension_semantics=("parallel",),
            vmem_limit_bytes=vmem_limit,
        ),
    )(x2d)

    if hw_pad != hw:
        out2d = out2d[:, :hw]
    return out2d.reshape(b, c, h, w)


def simam_reference(x, e_lambda=0.0001):
    b, c, h, w = x.shape
    n = w * h - 1
    mu = jnp.mean(x, axis=(2, 3), keepdims=True)
    d2 = (x - mu) ** 2
    y = d2 / (4.0 * (jnp.sum(d2, axis=(2, 3), keepdims=True) / n + e_lambda)) + 0.5
    return jax.nn.sigmoid(y)


if __name__ == "__main__":
    key = jax.random.PRNGKey(0)
    B, C, H, W = 2, 4, 16, 16
    x = jax.random.normal(key, (B, C, H, W), dtype=jnp.float32)

    out = simam(x, e_lambda=0.0001)
    out = jax.block_until_ready(out)

    ref = simam_reference(x, e_lambda=0.0001)
    assert out.shape == (B, C, H, W)
    assert jnp.allclose(out, ref, atol=1e-5, rtol=1e-5), "mismatch vs reference"

    print("KERNEL_OK")
</pallas_src>

<mosaic_0001>
module attributes {stable_mosaic.version = 11 : i64} {
  func.func @_simam_kernel(%arg0: i32, %arg1: memref<8x256xf32, #tpu.memory_space<vmem>>, %arg2: memref<8x256xf32, #tpu.memory_space<vmem>>) attributes {dimension_semantics = [#tpu.dimension_semantics<parallel>], iteration_bounds = array<i64: 1>, scalar_prefetch = 0 : i64, scratch_operands = 0 : i64, tpu.core_type = #tpu.core_type<tc>, window_params = [{transform_indices = @transform_0, window_bounds = array<i64: 8, 256>}, {transform_indices = @transform_1, window_bounds = array<i64: 8, 256>}]} {
    %c0 = arith.constant 0 : index
    %c0_0 = arith.constant 0 : index
    %0 = vector.load %arg1[%c0, %c0_0] : memref<8x256xf32, #tpu.memory_space<vmem>>, vector<8x256xf32>
    %cst = arith.constant dense<0.000000e+00> : vector<8xf32>
    %1 = vector.multi_reduction <add>, %0, %cst [1] : vector<8x256xf32> to vector<8xf32>
    %2 = vector.shape_cast %1 : vector<8xf32> to vector<8x1xf32>
    %3 = arith.mulf %0, %0 : vector<8x256xf32>
    %cst_1 = arith.constant dense<0.000000e+00> : vector<8xf32>
    %4 = vector.multi_reduction <add>, %3, %cst_1 [1] : vector<8x256xf32> to vector<8xf32>
    %5 = vector.shape_cast %4 : vector<8xf32> to vector<8x1xf32>
    %cst_2 = arith.constant 3.906250e-03 : f32
    %6 = vector.broadcast %cst_2 : f32 to vector<8x1xf32>
    %7 = arith.mulf %2, %6 : vector<8x1xf32>
    %8 = arith.mulf %2, %7 : vector<8x1xf32>
    %9 = arith.subf %5, %8 : vector<8x1xf32>
    %cst_3 = arith.constant 0.00392156886 : f32
    %10 = vector.broadcast %cst_3 : f32 to vector<8x1xf32>
    %11 = arith.mulf %9, %10 : vector<8x1xf32>
    %cst_4 = arith.constant 9.99999974E-5 : f32
    %12 = vector.broadcast %cst_4 : f32 to vector<8x1xf32>
    %13 = arith.addf %11, %12 : vector<8x1xf32>
    %cst_5 = arith.constant 4.000000e+00 : f32
    %14 = vector.broadcast %cst_5 : f32 to vector<8x1xf32>
    %15 = arith.mulf %14, %13 : vector<8x1xf32>
    %16 = tpu.reciprocal %15 : vector<8x1xf32> -> vector<8x1xf32>
    %17 = vector.broadcast %7 : vector<8x1xf32> to vector<8x256xf32>
    %18 = arith.subf %0, %17 : vector<8x256xf32>
    %19 = arith.mulf %18, %18 : vector<8x256xf32>
    %20 = vector.broadcast %16 : vector<8x1xf32> to vector<8x256xf32>
    %21 = arith.mulf %19, %20 : vector<8x256xf32>
    %cst_6 = arith.constant 5.000000e-01 : f32
    %22 = vector.broadcast %cst_6 : f32 to vector<8x256xf32>
    %23 = arith.addf %21, %22 : vector<8x256xf32>
    %cst_7 = arith.constant 5.000000e-01 : f32
    %24 = vector.broadcast %cst_7 : f32 to vector<8x256xf32>
    %25 = arith.mulf %24, %23 : vector<8x256xf32>
    %26 = math.tanh %25 : vector<8x256xf32>
    %cst_8 = arith.constant 5.000000e-01 : f32
    %27 = vector.broadcast %cst_8 : f32 to vector<8x256xf32>
    %28 = arith.mulf %27, %26 : vector<8x256xf32>
    %cst_9 = arith.constant 5.000000e-01 : f32
    %29 = vector.broadcast %cst_9 : f32 to vector<8x256xf32>
    %30 = arith.addf %28, %29 : vector<8x256xf32>
    %c0_10 = arith.constant 0 : index
    %c0_11 = arith.constant 0 : index
    %31 = vector.load %arg2[%c0_10, %c0_11] : memref<8x256xf32, #tpu.memory_space<vmem>>, vector<8x256xf32>
    tpu.vector_store %arg2[%c0_10, %c0_11], %30 {strides = array<i32>} : memref<8x256xf32, #tpu.memory_space<vmem>>, vector<8x256xf32>,
    return
  }
  func.func @transform_0(%arg0: i32) -> (i32, i32) {
    %c0_i32 = arith.constant 0 : i32
    %c0_i32_0 = arith.constant 0 : i32
    return %arg0, %c0_i32 : i32, i32
  }
  func.func @transform_1(%arg0: i32) -> (i32, i32) {
    %c0_i32 = arith.constant 0 : i32
    %c0_i32_0 = arith.constant 0 : i32
    return %arg0, %c0_i32 : i32, i32
  }
}

</mosaic_0001>

<bundles_post_ra>
// kernel: tpu_custom_call.1
= control target key start
LH: loop header
LB: loop body
LE: loop exit
PB: predicated region body
PF: predicated region fallthrough
CT: control target
= control target key end

     0   :  { %6 = vsyncpa [#allocation3], 0  ;;  %s163_s0 = inlined_call_operand.hbm [shape: f32[8,256], index: 0, kind: input, shape index: {}]   ;;  %s164_s1 = inlined_call_operand.hbm [shape: f32[8,256], index: 1, kind: output, shape index: {}]  }
   0x1   :  { %7 = vsyncpa [#allocation4], 0  ;;  %s127_s6 = smov [#allocation2]   ;;  %s79_s10 = scalar_lea.hbm %s163_s0, 256 }
   0x2   :  { %s14_s7 = sshll.u32 %s127_s6, 4  ;;  %p80_p0 = scmp.ne.s32.totalorder %s163_s0, %s79_s10  ;;  %s15_s7 = int_to_ptr.vmem [resolvable:$true] %s14_s7 }
   0x3   :  { %p83_p1 = scmp.lt.u32.totalorder %s79_s10, %s163_s0 }
   0x5   :  { %p85_p2 = pnand %p83_p1, %p80_p0 }
   0x7   :  { %88 = shalt.err (!%p85_p2)
}
   0x8   :  { %s89_s15 = scalar_lea.vmem %s15_s7, 256  ;;  %p94_p4 = scmp.lt.s32.totalorder %s15_s7, %s15_s7 }
   0x9   :  { %p90_p3 = scmp.ne.s32.totalorder %s15_s7, %s89_s15  ;;  %p95_p5 = scmp.lt.s32.totalorder %s89_s15, %s89_s15 }
   0xb   :  { %p96_p6 = por %p95_p5, %p94_p4 }
   0xd   :  { %p97_p7 = pnand %p96_p6, %p90_p3 }
   0xf   :  { %100 = shalt.err (!%p97_p7)
}
  0x10   :  { %17 = dma.hbm_to_vmem [thread:$0]  %s163_s0, 256, %s15_s7, [#allocation3]  }
  0x11   :  { %123 = dma.done.wait [#allocation3], 256  }
  0x12   :  { %124 = vsyncadd [#allocation3], 4294967040  ;;  %v21_v0 = vld [vmem:[#allocation2] sm:$0xff]  ;;  %v22_v1 = vld [vmem:[#allocation2 + $0x8] sm:$0xff]  ;;  %s128_s0 = smov [#allocation5]  }
  0x13   :  { %v23_v2 = vadd.f32 %v22_v1, %v21_v0  ;;  %v26_v3 = vmul.f32 %v21_v0, %v21_v0  ;;  %v27_v4 = vmul.f32 %v22_v1, %v22_v1  ;;  %s62_s18 = sshll.u32 %s128_s0, 4  ;;  %s63_s18 = int_to_ptr.vmem [resolvable:$true] %s62_s18 }
  0x14   :  { %s101_s19 = scalar_lea.vmem %s63_s18, 256  ;;  %p106_p9 = scmp.lt.s32.totalorder %s63_s18, %s63_s18 }
  0x15   :  { %24 = vadd.xlane.f32.xlu0 %v23_v2  ;;  %v28_v5 = vadd.f32 %v27_v4, %v26_v3  ;;  %p102_p8 = scmp.ne.s32.totalorder %s63_s18, %s101_s19  ;;  %p107_p10 = scmp.lt.s32.totalorder %s101_s19, %s101_s19 }
  0x17   :  { %p108_p11 = por %p107_p10, %p106_p9 }
  0x19   :  { %29 = vadd.xlane.f32.xlu0 %v28_v5  ;;  %p109_p12 = pnand %p108_p11, %p102_p8 }
  0xa2   :  { %v25_v6 = vpop.xlane.xlu0 %24 }
  0xa3   :  { %v31_v7 = vmul.f32 0.00390625, %v25_v6 }
  0xa5   :  { %v32_v8 = vmul.f32 %v31_v7, %v25_v6  ;;  %v38_v14 = vsub.f32 %v21_v0, %v31_v7  ;;  %v39_v15 = vsub.f32 %v22_v1, %v31_v7 }
  0xa6   :  { %v30_v9 = vpop.xlane.xlu0 %29 }
  0xa7   :  { %v33_v10 = vsub.f32 %v30_v9, %v32_v8  ;;  %v40_v16 = vmul.f32 %v38_v14, %v38_v14  ;;  %v41_v17 = vmul.f32 %v39_v15, %v39_v15 }
  0xa9   :  { %v34_v11 = vmul.f32 0.003921569, %v33_v10 }
  0xab   :  { %v35_v12 = vadd.f32 0.0001, %v34_v11 }
  0xad   :  { %v36_v13 = vmul.f32 4.0, %v35_v12 }
  0xaf   :  { %73 = vrcp.f32 %v36_v13 }
  0xb9   :  { %v74_v18 = vpop.eup %73 }
  0xba   :  { %v42_v19 = vmul.f32 %v74_v18, %v40_v16  ;;  %v43_v20 = vmul.f32 %v74_v18, %v41_v17 }
  0xbc   :  { %v44_v21 = vadd.f32 0.5, %v42_v19  ;;  %v45_v22 = vadd.f32 0.5, %v43_v20 }
  0xbe   :  { %v46_v23 = vmul.f32 0.5, %v44_v21  ;;  %v47_v24 = vmul.f32 0.5, %v45_v22 }
  0xc0   :  { %75 = vtanh.f32 %v46_v23 }
  0xc1   :  { %77 = vtanh.f32 %v47_v24 }
  0xca   :  { %v76_v25 = vpop.eup %75 }
  0xcb   :  { %v78_v26 = vpop.eup %77  ;;  %v50_v27 = vmul.f32 0.5, %v76_v25 }
  0xcc   :  { %v51_v28 = vmul.f32 0.5, %v78_v26 }
  0xcd   :  { %v52_v29 = vadd.f32 0.5, %v50_v27 }
  0xce   :  { %v53_v30 = vadd.f32 0.5, %v51_v28 }
  0xcf   :  { %54 = vst [vmem:[#allocation5] sm:$0xff] %v52_v29 }
  0xd0   :  { %55 = vst [vmem:[#allocation5 + $0x8] sm:$0xff] %v53_v30 }
  0xd1   :  { %112 = shalt.err (!%p109_p12)
}
  0xd2   :  { %s113_s22 = scalar_lea.hbm %s164_s1, 256 }
  0xd3   :  { %p114_p13 = scmp.ne.s32.totalorder %s164_s1, %s113_s22  ;;  %p117_p0 = scmp.lt.u32.totalorder %s113_s22, %s164_s1 }
  0xd5   :  { %p119_p1 = pnand %p117_p0, %p114_p13 }
  0xd7   :  { %122 = shalt.err (!%p119_p1)
}
  0xd8   :  { %65 = dma.vmem_to_hbm [thread:$0]  %s63_s18, 256, %s164_s1, [#allocation4]  }
  0xd9   :  { %125 = dma.done.wait [#allocation4], 256  }
  0xda   :  { %126 = vsyncadd [#allocation4], 4294967040 }
  0xdb   :  { %69 = vsyncpa [#allocation3], 1 }
  0xdc   :  { %70 = vsyncpa [#allocation4], 1 }

</bundles_post_ra>
